<compile_context>
chip_gen: v7x
topology: tpu7x:2x2x1
jax: 0.10.0
libtpu: 0.0.40
codegen_flags: <defaults>
</compile_context>

<pallas_src>
import functools

import jax
import jax.numpy as jnp
from jax.experimental import pallas as pl
from jax.experimental.pallas import tpu as pltpu


def _label_smoothing_kernel(out_ref, tgt_ref, loss_ref, *, eps, num_classes,
                            ignore_index):
    x = out_ref[...].astype(jnp.float32)          # (bb, V)
    t = tgt_ref[...]                              # (bb, 1) int32

    non_pad = (t != ignore_index).astype(jnp.float32)        # (bb, 1)
    t_clamped = jnp.where(t == ignore_index, 0, t)            # (bb, 1)

    # Lane-index compare selects the target column; the smoothed distribution
    # is expressed as a two-value select, never materialized as one_hot math.
    col = jax.lax.broadcasted_iota(jnp.int32, x.shape, 1)     # (bb, V)
    is_t = col == t_clamped                                   # (bb, V) bool

    w_tgt = jnp.float32(1.0 - eps)                 # smoothed weight, target col
    w_uni = jnp.float32(eps / num_classes)         # smoothed weight, other cols
    coeff = jnp.where(is_t, w_tgt, w_uni)                     # (bb, V)

    # Reduction sweep 1: row max (stable log-sum-exp).
    m = jnp.max(x, axis=-1, keepdims=True)                    # (bb, 1)
    # Reduction sweep 2: sum of exp (exp runs on the EUP slot).
    s_e = jnp.sum(jnp.exp(x - m), axis=-1, keepdims=True)     # (bb, 1)
    # Reduction sweep 3: weighted logit sum  sum_i smoothed_i * x_i.
    wsum = jnp.sum(x * coeff, axis=-1, keepdims=True)         # (bb, 1)

    lse = jnp.log(s_e) + m
    # loss = -sum_i smoothed_i * (x_i - lse)
    #      = (sum_i smoothed_i) * lse - wsum,  with sum_i smoothed_i = 1 - eps/V
    loss = (1.0 - eps / num_classes) * lse - wsum

    # Output last-dim is 1 -> masked vst, but output bytes are negligible vs
    # the (B, V) read, so no lane-dense reshuffle.
    loss_ref[...] = loss * non_pad


def _round_up(n, m):
    return -(-n // m) * m


def _vmem_capacity_bytes():
    """Physical per-core VMEM; fall back to the v7x floor (64 MiB) if unknown."""
    try:
        info = pltpu.get_tpu_info()
        cap = getattr(info, "vmem_capacity_bytes", None)
        if cap:
            return int(cap)
    except Exception:
        pass
    return 64 * 1024 * 1024


def _pick_block_b(B, V, dtype):
    """Pick the row tile and a matching vmem limit.

    Per grid step we budget:
      * 2x double-buffered (block_b, V) logits tile in the input dtype
      * ~3 full-width (block_b, V) f32 temporaries in the kernel body
        (the f32 upcast, exp(x-m), and the x*coeff product)
    against ~70% of physical VMEM (headroom for Mosaic scratch / output bufs).
    """
    itemsize = jnp.dtype(dtype).itemsize
    per_row = 2 * V * itemsize + 3 * V * 4

    usable = int(_vmem_capacity_bytes() * 0.70)

    rows = max(8, (usable // per_row) // 8 * 8)
    rows = min(rows, _round_up(B, 8))

    # Allow >= 2 grid steps (one per v7x TensorCore with "parallel" semantics)
    # only if each step's logits tile stays >= ~2 MiB (DMA-efficient regime).
    min_rows_2mib = _round_up(max(8, -(-(2 * 1024 * 1024) // (V * itemsize))), 8)
    half_rows = _round_up(-(-B // 2), 8)
    if half_rows >= min_rows_2mib:
        rows = min(rows, half_rows)
    rows = max(rows, 8)

    need = rows * per_row + 2 * 1024 * 1024
    vmem_limit = int(min(max(need, 16 * 1024 * 1024), usable))
    return rows, vmem_limit


def label_smoothing_loss(output, target, *, label_smoothing, tgt_vocab_size,
                         ignore_index=-100, block_b=None):
    """output: (B, V) float32/bfloat16 logits, target: (B,) int -> loss: (B,) f32."""
    B, V = output.shape
    assert V == tgt_vocab_size

    if block_b is None:
        block_b, vmem_limit = _pick_block_b(B, V, output.dtype)
    else:
        _, vmem_limit = _pick_block_b(B, V, output.dtype)
    assert block_b % 8 == 0

    # Pad batch to a multiple of block_b; padded rows use ignore_index so their
    # loss is exactly 0 and is sliced away afterwards.
    Bp = _round_up(B, block_b)
    tgt = target.astype(jnp.int32)
    if Bp != B:
        output = jnp.pad(output, ((0, Bp - B), (0, 0)))
        tgt = jnp.pad(tgt, ((0, Bp - B),), constant_values=ignore_index)
    tgt2d = tgt.reshape(Bp, 1)

    kernel = functools.partial(
        _label_smoothing_kernel,
        eps=float(label_smoothing),
        num_classes=int(tgt_vocab_size),
        ignore_index=int(ignore_index),
    )

    loss2d = pl.pallas_call(
        kernel,
        out_shape=jax.ShapeDtypeStruct((Bp, 1), jnp.float32),
        grid_spec=pltpu.PrefetchScalarGridSpec(
            num_scalar_prefetch=0,
            grid=(Bp // block_b,),
            in_specs=[
                pl.BlockSpec((block_b, V), lambda i: (i, 0)),
                pl.BlockSpec((block_b, 1), lambda i: (i, 0)),
            ],
            out_specs=pl.BlockSpec((block_b, 1), lambda i: (i, 0)),
        ),
        compiler_params=pltpu.CompilerParams(
            dimension_semantics=("parallel",),
            vmem_limit_bytes=vmem_limit,
        ),
    )(output, tgt2d)

    return loss2d.reshape(Bp)[:B]


def _reference(output, target, *, label_smoothing, tgt_vocab_size,
               ignore_index=-100):
    eps = label_smoothing
    non_pad = (target != ignore_index).astype(jnp.float32)
    t = jnp.where(target == ignore_index, 0, target)
    one_hot = jax.nn.one_hot(t, tgt_vocab_size, dtype=jnp.float32)
    one_hot = one_hot * (1 - eps) + (1 - one_hot) * eps / tgt_vocab_size
    log_prb = jax.nn.log_softmax(output.astype(jnp.float32), axis=-1)
    loss = -(one_hot * log_prb).sum(axis=-1)
    return loss * non_pad


if __name__ == "__main__":
    EPS = 0.1         # label_smoothing
    IGNORE = -100     # ignore_index

    def run_case(B, V, dtype, key):
        k_out, k_tgt, k_pad = jax.random.split(key, 3)
        output = jax.random.normal(k_out, (B, V), dtype=jnp.float32).astype(dtype)
        target = jax.random.randint(k_tgt, (B,), 0, V, dtype=jnp.int32)
        pad_mask = jax.random.bernoulli(k_pad, p=0.25, shape=(B,))
        target = jnp.where(pad_mask, IGNORE, target)

        loss = label_smoothing_loss(output, target, label_smoothing=EPS,
                                    tgt_vocab_size=V, ignore_index=IGNORE)
        loss = jax.block_until_ready(loss)

        ref = _reference(output, target, label_smoothing=EPS,
                         tgt_vocab_size=V, ignore_index=IGNORE)
        assert loss.shape == (B,)
        assert jnp.allclose(loss, ref, atol=2e-4, rtol=2e-4), (dtype, V, loss, ref)

    key = jax.random.PRNGKey(0)
    k1, k2, k3 = jax.random.split(key, 3)
    run_case(16, 128, jnp.float32, k1)    # lane-aligned vocab, f32
    run_case(16, 1000, jnp.float32, k2)   # vocab NOT a multiple of 128 (lane-pad mask path)
    run_case(16, 128, jnp.bfloat16, k3)   # bf16 logits (halves HBM traffic)

    print("KERNEL_OK")
</pallas_src>

<mosaic_0001>
module attributes {stable_mosaic.version = 11 : i64} {
  func.func @_label_smoothing_kernel(%arg0: i32, %arg1: memref<16x128xf32, #tpu.memory_space<vmem>>, %arg2: memref<16x1xi32, #tpu.memory_space<vmem>>, %arg3: memref<16x1xf32, #tpu.memory_space<vmem>>) attributes {dimension_semantics = [#tpu.dimension_semantics<parallel>], iteration_bounds = array<i64: 1>, scalar_prefetch = 0 : i64, scratch_operands = 0 : i64, tpu.core_type = #tpu.core_type<tc>, window_params = [{transform_indices = @transform_0, window_bounds = array<i64: 16, 128>}, {transform_indices = @transform_1, window_bounds = array<i64: 16, 1>}, {transform_indices = @transform_2, window_bounds = array<i64: 16, 1>}]} {
    %c0 = arith.constant 0 : index
    %c0_0 = arith.constant 0 : index
    %0 = vector.load %arg1[%c0, %c0_0] : memref<16x128xf32, #tpu.memory_space<vmem>>, vector<16x128xf32>
    %c0_1 = arith.constant 0 : index
    %c0_2 = arith.constant 0 : index
    %1 = vector.load %arg2[%c0_1, %c0_2] : memref<16x1xi32, #tpu.memory_space<vmem>>, vector<16x1xi32>
    %c-100_i32 = arith.constant -100 : i32
    %2 = vector.broadcast %c-100_i32 : i32 to vector<16x1xi32>
    %3 = arith.cmpi ne, %1, %2 : vector<16x1xi32>
    %4 = arith.extui %3 : vector<16x1xi1> to vector<16x1xi32>
    %5 = arith.sitofp %4 : vector<16x1xi32> to vector<16x1xf32>
    %c-100_i32_3 = arith.constant -100 : i32
    %6 = vector.broadcast %c-100_i32_3 : i32 to vector<16x1xi32>
    %7 = arith.cmpi eq, %1, %6 : vector<16x1xi32>
    %c0_i32 = arith.constant 0 : i32
    %8 = vector.broadcast %c0_i32 : i32 to vector<16x1xi32>
    %9 = arith.select %7, %8, %1 : vector<16x1xi1>, vector<16x1xi32>
    %10 = tpu.iota {dimensions = array<i32: 1>} : vector<16x128xi32>
    %11 = vector.broadcast %9 : vector<16x1xi32> to vector<16x128xi32>
    %12 = arith.cmpi eq, %10, %11 : vector<16x128xi32>
    %cst = arith.constant 0.899999976 : f32
    %cst_4 = arith.constant 7.812500e-04 : f32
    %13 = vector.broadcast %cst : f32 to vector<16x128xf32>
    %14 = vector.broadcast %cst_4 : f32 to vector<16x128xf32>
    %15 = arith.select %12, %13, %14 : vector<16x128xi1>, vector<16x128xf32>
    %cst_5 = arith.constant dense<0xFF800000> : vector<16xf32>
    %16 = vector.multi_reduction <maximumf>, %0, %cst_5 [1] : vector<16x128xf32> to vector<16xf32>
    %17 = vector.shape_cast %16 : vector<16xf32> to vector<16x1xf32>
    %18 = vector.broadcast %17 : vector<16x1xf32> to vector<16x128xf32>
    %19 = arith.subf %0, %18 : vector<16x128xf32>
    %20 = math.exp %19 : vector<16x128xf32>
    %cst_6 = arith.constant dense<0.000000e+00> : vector<16xf32>
    %21 = vector.multi_reduction <add>, %20, %cst_6 [1] : vector<16x128xf32> to vector<16xf32>
    %22 = vector.shape_cast %21 : vector<16xf32> to vector<16x1xf32>
    %23 = arith.mulf %0, %15 : vector<16x128xf32>
    %cst_7 = arith.constant dense<0.000000e+00> : vector<16xf32>
    %24 = vector.multi_reduction <add>, %23, %cst_7 [1] : vector<16x128xf32> to vector<16xf32>
    %25 = vector.shape_cast %24 : vector<16xf32> to vector<16x1xf32>
    %26 = math.log %22 : vector<16x1xf32>
    %27 = arith.addf %26, %17 : vector<16x1xf32>
    %cst_8 = arith.constant 0.999218761 : f32
    %28 = vector.broadcast %cst_8 : f32 to vector<16x1xf32>
    %29 = arith.mulf %28, %27 : vector<16x1xf32>
    %30 = arith.subf %29, %25 : vector<16x1xf32>
    %31 = arith.mulf %30, %5 : vector<16x1xf32>
    %c0_9 = arith.constant 0 : index
    %c0_10 = arith.constant 0 : index
    %32 = vector.load %arg3[%c0_9, %c0_10] : memref<16x1xf32, #tpu.memory_space<vmem>>, vector<16x1xf32>
    tpu.vector_store %arg3[%c0_9, %c0_10], %31 {strides = array<i32>} : memref<16x1xf32, #tpu.memory_space<vmem>>, vector<16x1xf32>,
    return
  }
  func.func @transform_0(%arg0: i32) -> (i32, i32) {
    %c0_i32 = arith.constant 0 : i32
    %c0_i32_0 = arith.constant 0 : i32
    return %arg0, %c0_i32 : i32, i32
  }
  func.func @transform_1(%arg0: i32) -> (i32, i32) {
    %c0_i32 = arith.constant 0 : i32
    %c0_i32_0 = arith.constant 0 : i32
    return %arg0, %c0_i32 : i32, i32
  }
  func.func @transform_2(%arg0: i32) -> (i32, i32) {
    %c0_i32 = arith.constant 0 : i32
    %c0_i32_0 = arith.constant 0 : i32
    return %arg0, %c0_i32 : i32, i32
  }
}

</mosaic_0001>

<bundles_post_ra>
// kernel: tpu_custom_call.1
= control target key start
LH: loop header
LB: loop body
LE: loop exit
PB: predicated region body
PF: predicated region fallthrough
CT: control target
= control target key end

     0   :  { %v91_v1 = vmov 0   ;;  %v25_v9 = vlaneseq  ;;  %v92_v17 = vmov 0.00078125   ;;  %v93_v33 = vmov 0.0   ;;  %s127_s0 = inlined_call_operand.vmem [shape: f32[16,128], index: 0, kind: input, shape index: {}]   ;;  %s128_s1 = inlined_call_operand.vmem [shape: s32[16,1], index: 1, kind: input, shape index: {}]   ;;  %s129_s2 = inlined_call_operand.vmem [shape: f32[16,1], index: 2, kind: output, shape index: {}]  }
   0x1   :  { %v11_v0 = vld [vmem:[%s127_s0] sm:$0xff]  ;;  %81 = vset.pattern.permute.xlu1 %v91_v1  ;;  %82 = vset.pattern.permute.xlu0 %v91_v1  ;;  %v14_v3 = vld [vmem:[%s128_s1 + $0x8] sm:$0xff]  ;;  %vm69_vm6 = vcmask 7168  }
   0x2   :  { %v13_v2 = vld [vmem:[%s128_s1] sm:$0xff]  ;;  %37 = vmax.xlane.f32.xlu0 %v11_v0  ;;  %v12_v4 = vld [vmem:[%s127_s0 + $0x8] sm:$0xff]  ;;  %vm22_vm1 = vcmp.eq.s32.totalorder %v14_v3, 4294967196  ;;  %v26_v14 = vand.u32 127, %v25_v9  ;;  %vm16_vm5 = vcmp.ne.s32.totalorder %v14_v3, 4294967196 }
   0x3   :  { %vm21_vm0 = vcmp.eq.s32.totalorder %v13_v2, 4294967196  ;;  %v24_v6 = vsel %vm22_vm1, 0, %v14_v3  ;;  %vm15_vm4 = vcmp.ne.s32.totalorder %v13_v2, 4294967196  ;;  %v77_v39 = vsel %vm16_vm5, 1.0, %v93_v33 }
   0x4   :  { %v23_v5 = vsel %vm21_vm0, 0, %v13_v2  ;;  %v76_v34 = vsel %vm15_vm4, 1.0, %v93_v33 }
   0x5   :  { %28 = vperm.xlu1 %81, %v23_v5  }
   0x6   :  { %39 = vmax.xlane.f32.xlu0 %v12_v4 }
   0x9   :  { %31 = vperm.xlu1 %81, %v24_v6  }
  0x84   :  { %v29_v13 = vpop.permute.xlu1 %28 }
  0x85   :  { %vm33_vm2 = vcmp.eq.s32.totalorder %v26_v14, %v29_v13 }
  0x86   :  { %v35_v18 = vsel %vm33_vm2, 0.9, %v92_v17 }
  0x87   :  { %v51_v20 = vmul.f32 %v35_v18, %v11_v0 }
  0x88   :  { %v32_v16 = vpop.permute.xlu1 %31 }
  0x89   :  { %vm34_vm3 = vcmp.eq.s32.totalorder %v26_v14, %v32_v16 }
  0x8a   :  { %v36_v21 = vsel %vm34_vm3, 0.9, %v92_v17 }
  0x8b   :  { %v52_v23 = vmul.f32 %v36_v21, %v12_v4 }
  0x8f   :  { %v38_v7 = vpop.xlane.xlu0 %37 }
  0x90   :  { %v41_v8 = vsub.f32 %v11_v0, %v38_v7 }
  0x92   :  { %v43_v10 = vmul.f32 1.442695, %v41_v8 }
  0x93   :  { %v40_v11 = vpop.xlane.xlu0 %39 }
  0x94   :  { %83 = vpow2.f32 %v43_v10  ;;  %v42_v12 = vsub.f32 %v12_v4, %v40_v11 }
  0x96   :  { %v45_v15 = vmul.f32 1.442695, %v42_v12 }
  0x98   :  { %85 = vpow2.f32 %v45_v15 }
  0x9e   :  { %v84_v19 = vpop.eup %83 }
  0x9f   :  { %47 = vadd.xlane.f32.xlu0 %v84_v19 }
  0xa2   :  { %v86_v22 = vpop.eup %85 }
  0xa3   :  { %49 = vadd.xlane.f32.xlu1 %v86_v22  ;;  %53 = vadd.xlane.f32.xlu0 %v51_v20 }
  0xa7   :  { %55 = vadd.xlane.f32.xlu0 %v52_v23 }
 0x12c   :  { %v48_v24 = vpop.xlane.xlu0 %47 }
 0x12d   :  { %87 = vlog2.f32 %v48_v24 }
 0x130   :  { %v50_v25 = vpop.xlane.xlu1 %49  ;;  %v54_v30 = vpop.xlane.xlu0 %53 }
 0x131   :  { %89 = vlog2.f32 %v50_v25 }
 0x134   :  { %v56_v40 = vpop.xlane.xlu0 %55 }
 0x137   :  { %v88_v26 = vpop.eup %87 }
 0x138   :  { %v58_v27 = vmul.f32 0.6931472, %v88_v26 }
 0x13a   :  { %v61_v28 = vadd.f32 %v58_v27, %v38_v7 }
 0x13b   :  { %v90_v29 = vpop.eup %89 }
 0x13c   :  { %v60_v31 = vmul.f32 0.6931472, %v90_v29  ;;  %v63_v32 = vmul.f32 0.99921876, %v61_v28 }
 0x13e   :  { %v65_v35 = vsub.f32 %v63_v32, %v54_v30  ;;  %v62_v36 = vadd.f32 %v60_v31, %v40_v11 }
 0x140   :  { %v67_v37 = vmul.f32 %v76_v34, %v65_v35  ;;  %v64_v38 = vmul.f32 0.99921876, %v62_v36 }
 0x142   :  { %70 = vst.msk [vmem:[%s129_s2] sm:$0xff] %vm69_vm6, %v67_v37  ;;  %v66_v41 = vsub.f32 %v64_v38, %v56_v40 }
 0x144   :  { %v68_v42 = vmul.f32 %v77_v39, %v66_v41 }
 0x146   :  { %71 = vst.msk [vmem:[%s129_s2 + $0x8] sm:$0xff] %vm69_vm6, %v68_v42 }

</bundles_post_ra>
